<compile_context>
chip_gen: v5e
topology: v5e:2x2
jax: 0.10.0
libtpu: 0.0.40
codegen_flags: <defaults>
</compile_context>

<pallas_src>
import functools

import jax
import jax.numpy as jnp
from jax.experimental import pallas as pl
from jax.experimental.pallas import tpu as pltpu


def _decoder_kernel(z_ref, w1_ref, bias_ref, w2_ref, out_ref, *, H, O):
    # Packed biases: [:, :H] = b1, [:, H:] = [b21 | b22 | 0-pad]
    b_all = bias_ref[...]                       # (1, H + P)
    b1 = b_all[:, :H]                           # (1, H)
    b2 = b_all[:, H:]                           # (1, P)

    # fc1 + ReLU
    h = jnp.dot(z_ref[...], w1_ref[...], preferred_element_type=jnp.float32)
    h = jnp.maximum(h + b1, 0.0)                # (TB, H)

    # Fused fc21|fc22 head: one MXU push, lane-dense (TB, P) result.
    s = jnp.dot(h, w2_ref[...], preferred_element_type=jnp.float32) + b2

    # ReLU + 1e-6 only on the variance columns [O, 2*O); loc columns untouched.
    col = jax.lax.broadcasted_iota(jnp.int32, s.shape, dimension=1)
    is_var = (col >= O) & (col < 2 * O)
    s = jnp.where(is_var, jnp.maximum(s, 0.0) + 1e-6, s)

    out_ref[...] = s.astype(out_ref.dtype)      # full-tile, unmasked store


def decoder_forward(z, w1, b1, w21, b21, w22, b22):
    """z: (B, Z). Weights are (in, out) = transposed PyTorch layout; biases (1, out)."""
    B, Z = z.shape
    H = w1.shape[1]
    O = w21.shape[1]
    P = 128 * pl.cdiv(2 * O, 128)               # lane-dense packed head width

    # --- one-time parameter packing (would be precomputed in a real model) ---
    w2p = jnp.zeros((H, P), jnp.float32)
    w2p = w2p.at[:, :O].set(w21).at[:, O:2 * O].set(w22)
    b2p = jnp.zeros((1, P), jnp.float32)
    b2p = b2p.at[:, :O].set(b21).at[:, O:2 * O].set(b22)
    bias = jnp.concatenate([b1.astype(jnp.float32), b2p], axis=1)   # (1, H + P)

    # --- batch tiling: weights stay VMEM-resident across batch tiles ---
    tb = B if B <= 512 else 512                 # multiple of 8 when tiling kicks in
    grid = (pl.cdiv(B, tb),)

    kernel = functools.partial(_decoder_kernel, H=H, O=O)

    out = pl.pallas_call(
        kernel,
        out_shape=jax.ShapeDtypeStruct((B, P), jnp.float32),
        grid=grid,
        in_specs=[
            pl.BlockSpec((tb, Z), lambda i: (i, 0)),        # z: tiled over batch
            pl.BlockSpec((Z, H), lambda i: (0, 0)),         # w1: resident
            pl.BlockSpec((1, H + P), lambda i: (0, 0)),     # packed biases: resident
            pl.BlockSpec((H, P), lambda i: (0, 0)),         # packed head weights: resident
        ],
        out_specs=pl.BlockSpec((tb, P), lambda i: (i, 0)),
        compiler_params=pltpu.CompilerParams(
            dimension_semantics=("parallel",)),
    )(z, w1, bias, w2p)

    loc = out[:, :O]
    var = out[:, O:2 * O]
    return loc, var


def reference_forward(z, w1, b1, w21, b21, w22, b22):
    h = jnp.maximum(z @ w1 + b1, 0.0)
    loc = h @ w21 + b21
    var = jnp.maximum(h @ w22 + b22, 0.0) + 1e-6
    return loc, var


if __name__ == "__main__":
    # Small shapes consistent with the module's forward pass (real model uses
    # hidden_dim=512, out_dim=5; same kernel handles both).
    B, Z_DIM, HIDDEN_DIM, OUT_DIM = 8, 16, 32, 5

    key = jax.random.PRNGKey(0)
    k_z, k_w1, k_b1, k_w21, k_b21, k_w22, k_b22 = jax.random.split(key, 7)

    # PyTorch-Linear-like init (uniform +/- 1/sqrt(fan_in)), weights pre-transposed.
    def init_linear(kw, kb, fan_in, fan_out):
        bound = 1.0 / jnp.sqrt(jnp.float32(fan_in))
        w = jax.random.uniform(kw, (fan_in, fan_out), jnp.float32, -bound, bound)
        b = jax.random.uniform(kb, (1, fan_out), jnp.float32, -bound, bound)
        return w, b

    w1, b1 = init_linear(k_w1, k_b1, Z_DIM, HIDDEN_DIM)
    w21, b21 = init_linear(k_w21, k_b21, HIDDEN_DIM, OUT_DIM)
    w22, b22 = init_linear(k_w22, k_b22, HIDDEN_DIM, OUT_DIM)

    z = jax.random.normal(k_z, (B, Z_DIM), jnp.float32)

    loc, var = decoder_forward(z, w1, b1, w21, b21, w22, b22)
    loc, var = jax.block_until_ready((loc, var))

    loc_ref, var_ref = reference_forward(z, w1, b1, w21, b21, w22, b22)
    assert loc.shape == (B, OUT_DIM) and var.shape == (B, OUT_DIM)
    assert jnp.allclose(loc, loc_ref, atol=1e-5, rtol=1e-5)
    assert jnp.allclose(var, var_ref, atol=1e-5, rtol=1e-5)
    assert bool(jnp.all(var > 0.0))

    print("KERNEL_OK")
</pallas_src>

<mosaic_0001>
module attributes {stable_mosaic.version = 11 : i64} {
  func.func @_decoder_kernel(%arg0: i32, %arg1: memref<8x16xf32, #tpu.memory_space<vmem>>, %arg2: memref<16x32xf32, #tpu.memory_space<vmem>>, %arg3: memref<1x160xf32, #tpu.memory_space<vmem>>, %arg4: memref<32x128xf32, #tpu.memory_space<vmem>>, %arg5: memref<8x128xf32, #tpu.memory_space<vmem>>) attributes {dimension_semantics = [#tpu.dimension_semantics<parallel>], iteration_bounds = array<i64: 1>, scalar_prefetch = 0 : i64, scratch_operands = 0 : i64, tpu.core_type = #tpu.core_type<tc>, window_params = [{transform_indices = @transform_0, window_bounds = array<i64: 8, 16>}, {pipeline_mode = #tpu.pipeline_mode<synchronous>, transform_indices = @transform_1, window_bounds = array<i64: 16, 32>}, {pipeline_mode = #tpu.pipeline_mode<synchronous>, transform_indices = @transform_2, window_bounds = array<i64: 1, 160>}, {pipeline_mode = #tpu.pipeline_mode<synchronous>, transform_indices = @transform_3, window_bounds = array<i64: 32, 128>}, {transform_indices = @transform_4, window_bounds = array<i64: 8, 128>}]} {
    %c0 = arith.constant 0 : index
    %c0_0 = arith.constant 0 : index
    %0 = vector.load %arg3[%c0, %c0_0] : memref<1x160xf32, #tpu.memory_space<vmem>>, vector<1x160xf32>
    %1 = vector.extract_strided_slice %0 {offsets = [0, 0], sizes = [1, 32], strides = [1, 1]} : vector<1x160xf32> to vector<1x32xf32>
    %2 = vector.extract_strided_slice %0 {offsets = [0, 32], sizes = [1, 128], strides = [1, 1]} : vector<1x160xf32> to vector<1x128xf32>
    %c0_1 = arith.constant 0 : index
    %c0_2 = arith.constant 0 : index
    %3 = vector.load %arg1[%c0_1, %c0_2] : memref<8x16xf32, #tpu.memory_space<vmem>>, vector<8x16xf32>
    %c0_3 = arith.constant 0 : index
    %c0_4 = arith.constant 0 : index
    %4 = vector.load %arg2[%c0_3, %c0_4] : memref<16x32xf32, #tpu.memory_space<vmem>>, vector<16x32xf32>
    %cst = arith.constant dense<0.000000e+00> : vector<8x32xf32>
    %5 = tpu.matmul %3, %4, %cst {dimension_numbers = #tpu.dot_dimension_numbers<[1], [0], [0], [1], [0, 0, 1, 1], [], []>} : vector<8x16xf32>, vector<16x32xf32>, vector<8x32xf32> -> vector<8x32xf32>
    %6 = vector.broadcast %1 : vector<1x32xf32> to vector<8x32xf32>
    %7 = arith.addf %5, %6 : vector<8x32xf32>
    %cst_5 = arith.constant 0.000000e+00 : f32
    %8 = vector.broadcast %cst_5 : f32 to vector<8x32xf32>
    %9 = arith.maximumf %7, %8 : vector<8x32xf32>
    %c0_6 = arith.constant 0 : index
    %c0_7 = arith.constant 0 : index
    %10 = vector.load %arg4[%c0_6, %c0_7] : memref<32x128xf32, #tpu.memory_space<vmem>>, vector<32x128xf32>
    %cst_8 = arith.constant dense<0.000000e+00> : vector<8x128xf32>
    %11 = tpu.matmul %9, %10, %cst_8 {dimension_numbers = #tpu.dot_dimension_numbers<[1], [0], [0], [1], [0, 0, 1, 1], [], []>} : vector<8x32xf32>, vector<32x128xf32>, vector<8x128xf32> -> vector<8x128xf32>
    %12 = vector.broadcast %2 : vector<1x128xf32> to vector<8x128xf32>
    %13 = arith.addf %11, %12 : vector<8x128xf32>
    %14 = tpu.iota {dimensions = array<i32: 1>} : vector<8x128xi32>
    %c5_i32 = arith.constant 5 : i32
    %15 = vector.broadcast %c5_i32 : i32 to vector<8x128xi32>
    %16 = arith.cmpi sge, %14, %15 : vector<8x128xi32>
    %c10_i32 = arith.constant 10 : i32
    %17 = vector.broadcast %c10_i32 : i32 to vector<8x128xi32>
    %18 = arith.cmpi slt, %14, %17 : vector<8x128xi32>
    %19 = arith.andi %16, %18 : vector<8x128xi1>
    %cst_9 = arith.constant 0.000000e+00 : f32
    %20 = vector.broadcast %cst_9 : f32 to vector<8x128xf32>
    %21 = arith.maximumf %13, %20 : vector<8x128xf32>
    %cst_10 = arith.constant 9.99999997E-7 : f32
    %22 = vector.broadcast %cst_10 : f32 to vector<8x128xf32>
    %23 = arith.addf %21, %22 : vector<8x128xf32>
    %24 = arith.select %19, %23, %13 : vector<8x128xi1>, vector<8x128xf32>
    %c0_11 = arith.constant 0 : index
    %c0_12 = arith.constant 0 : index
    %25 = vector.load %arg5[%c0_11, %c0_12] : memref<8x128xf32, #tpu.memory_space<vmem>>, vector<8x128xf32>
    tpu.vector_store %arg5[%c0_11, %c0_12], %24 {strides = array<i32>} : memref<8x128xf32, #tpu.memory_space<vmem>>, vector<8x128xf32>,
    return
  }
  func.func @transform_0(%arg0: i32) -> (i32, i32) {
    %c0_i32 = arith.constant 0 : i32
    %c0_i32_0 = arith.constant 0 : i32
    return %arg0, %c0_i32 : i32, i32
  }
  func.func @transform_1(%arg0: i32) -> (i32, i32) {
    %c0_i32 = arith.constant 0 : i32
    %c0_i32_0 = arith.constant 0 : i32
    %c0_i32_1 = arith.constant 0 : i32
    return %c0_i32, %c0_i32_0 : i32, i32
  }
  func.func @transform_2(%arg0: i32) -> (i32, i32) {
    %c0_i32 = arith.constant 0 : i32
    %c0_i32_0 = arith.constant 0 : i32
    %c0_i32_1 = arith.constant 0 : i32
    return %c0_i32, %c0_i32_0 : i32, i32
  }
  func.func @transform_3(%arg0: i32) -> (i32, i32) {
    %c0_i32 = arith.constant 0 : i32
    %c0_i32_0 = arith.constant 0 : i32
    %c0_i32_1 = arith.constant 0 : i32
    return %c0_i32, %c0_i32_0 : i32, i32
  }
  func.func @transform_4(%arg0: i32) -> (i32, i32) {
    %c0_i32 = arith.constant 0 : i32
    %c0_i32_0 = arith.constant 0 : i32
    return %arg0, %c0_i32 : i32, i32
  }
}

</mosaic_0001>

<bundles_post_ra>
// kernel: tpu_custom_call.1
= control target key start
LH: loop header
LB: loop body
LE: loop exit
PB: predicated region body
PF: predicated region fallthrough
CT: control target
= control target key end

     0   :  { %9 = vsyncpa [#allocation3], 0  ;;  %s359_s0 = inlined_call_operand.hbm [shape: f32[8,16], index: 0, kind: input, shape index: {}]   ;;  %s360_s1 = inlined_call_operand.hbm [shape: f32[16,32], index: 1, kind: input, shape index: {}]   ;;  %s361_s2 = inlined_call_operand.hbm [shape: f32[1,160], index: 2, kind: input, shape index: {}]   ;;  %s362_s3 = inlined_call_operand.hbm [shape: f32[32,128], index: 3, kind: input, shape index: {}]   ;;  %s363_s4 = inlined_call_operand.hbm [shape: f32[8,128], index: 4, kind: output, shape index: {}]  }
   0x1   :  { %10 = vsyncpa [#allocation6], 0 }
   0x2   :  { %11 = vsyncpa [#allocation9], 0  ;;  %s28_s17 = sshll.u32 %s360_s1, 4  ;;  %s29_s17 = int_to_ptr.hbm [resolvable:$true] %s28_s17 }
   0x3   :  { %12 = vsyncpa [#allocation4], 0  ;;  %s311_s18 = smov [#allocation5]   ;;  %s18_s22 = sshll.u32 %s359_s0, 4  ;;  %s19_s22 = int_to_ptr.hbm [resolvable:$true] %s18_s22 }
   0x4   :  { %s30_s19 = sshll.u32 %s311_s18, 4  ;;  %s312_s23 = smov 128   ;;  %s31_s19 = int_to_ptr.vmem [resolvable:$true] %s30_s19 }
   0x5   :  { %s313_s24 = smov 8   ;;  %s314_s25 = smov [#allocation2]  }
   0x6   :  { %36 = dma.hbm_to_vmem [thread:$0]  %s29_s17, 256, %s31_s19, [#allocation6], %s312_s23, %s312_s23, %s313_s24  }
   0x7   :  { %s20_s26 = sshll.u32 %s314_s25, 4  ;;  %s42_s29 = sshll.u32 %s361_s2, 4  ;;  %s21_s26 = int_to_ptr.vmem [resolvable:$true] %s20_s26  ;;  %s43_s29 = int_to_ptr.hbm [resolvable:$true] %s42_s29 }
   0x8   :  { %23 = dma.hbm_to_vmem [thread:$0]  %s19_s22, 128, %s21_s26, [#allocation3]  }
   0x9   :  { %s52_s5 = sshll.u32 %s362_s3, 4  ;;  %s315_s6 = smov [#allocation7]   ;;  %s53_s5 = int_to_ptr.hbm [resolvable:$true] %s52_s5 }
   0xa   :  { %s44_s7 = sshll.u32 %s315_s6, 4  ;;  %s316_s0 = smov [#allocation8]   ;;  %s45_s7 = int_to_ptr.vmem [resolvable:$true] %s44_s7 }
   0xb   :  { %47 = dma.hbm_to_vmem [thread:$0]  %s43_s29, 32, %s45_s7, [#allocation6]  }
   0xc   :  { %s54_s8 = sshll.u32 %s316_s0, 4  ;;  %s55_s8 = int_to_ptr.vmem [resolvable:$true] %s54_s8 }
   0xd   :  { %60 = dma.hbm_to_vmem [thread:$0]  %s53_s5, 512, %s55_s8, [#allocation9], %s312_s23, %s312_s23, %s313_s24  }
   0xe   :  { %303 = dma.done.wait [#allocation3], 128  }
   0xf   :  { %304 = vsyncadd [#allocation3], 4294967168 }
  0x10   :  { %305 = dma.done.wait [#allocation6], 288  }
  0x11   :  { %306 = vsyncadd [#allocation6], 4294967008 }
  0x12   :  { %307 = dma.done.wait [#allocation9], 512  }
  0x13   :  { %308 = vsyncadd [#allocation9], 4294966784  ;;  %v80_v0 = vld [vmem:[#allocation5 + $0x8] sm:$0xff]  ;;  %v79_v1 = vld [vmem:[#allocation5] sm:$0xff]  ;;  %vm84_vm0 = vcmask 130048   ;;  %s317_s2 = smov 96   ;;  %v145_v14 = vlaneseq }
  0x14   :  { %102 = vmatpush.msra.mxu0 %v80_v0  ;;  %v78_v2 = vld [vmem:[#allocation2] sm:$0xff]  ;;  %v112_v3 = vld [vmem:[#allocation8 + $0x18] sm:$0xff]  ;;  %v111_v7 = vld [vmem:[#allocation8 + $0x10] sm:$0xff]  ;;  %vm121_vm1 = vcmask 261120   ;;  %vm118_vm2 = vcmask 785408   ;;  %s318_s3 = smov [#allocation10]  }
  0x15   :  { %v77_v4 = vld [vmem:[#allocation7] sm:$0x3]  ;;  %137 = vmatpush.msra.mxu1 %v112_v3  ;;  %v110_v8 = vld [vmem:[#allocation8 + $0x8] sm:$0xff]  ;;  %v109_v9 = vld [vmem:[#allocation8] sm:$0xff]  ;;  %v146_v16 = vand.u32 127, %v145_v14  ;;  %s159_s9 = sshll.u32 %s318_s3, 4  ;;  %s160_s9 = int_to_ptr.vmem [resolvable:$true] %s159_s9 }
  0x16   :  { %v82_v5 = vperm.slane %v77_v4, 0  ;;  %103 = vmatpush.msra.mxu0 %v79_v1  ;;  %v113_v6 = vperm.slane %v77_v4, 1  ;;  %s161_s12 = sshll.u32 %s363_s4, 4  ;;  %s162_s12 = int_to_ptr.hbm [resolvable:$true] %s161_s12 }
  0x17   :  { %173 = vmatmul.msk.f32.vlgmr.msra.gmra.mxu0 %vm84_vm0, %v78_v2  ;;  %138 = vmatpush.msra.mxu1 %v111_v7  ;;  %vm147_vm3 = vcmp.ge.s32.totalorder %v146_v16, 5  ;;  %vm148_vm4 = vcmp.lt.s32.totalorder %v146_v16, 10 }
  0x18   :  { %114 = vrot.lane.b32.xlu0 %v82_v5, %s317_s2  ;;  %vm149_vm5 = vmand %vm147_vm3, %vm148_vm4 }
  0x19   :  { %139 = vmatpush.msra.mxu1 %v110_v8 }
  0x1b   :  { %140 = vmatpush.msra.mxu1 %v109_v9 }
  0x20   :  { %116 = vrot.lane.b32.xlu0 %v113_v6, %s317_s2 }
  0x8a   :  { %v115_v13 = vpop.permute.xlu0 %114 }
  0x92   :  { %v117_v15 = vpop.permute.xlu0 %116 }
  0x93   :  { %v119_v17 = vsel %vm118_vm2, %v115_v13, %v117_v15 }
  0x94   :  { %v105_v10 = vpop.f32.mrf.mxu0 }
  0x95   :  { %v106_v11 = vadd.f32 %v105_v10, %v82_v5 }
  0x97   :  { %v108_v12 = vmax.f32 %v106_v11, 0.0 }
  0x99   :  { %174 = vmatmul.msk.f32.vlgmr.msra.gmra.mxu1 %vm121_vm1, %v108_v12 }
 0x116   :  { %v142_v18 = vpop.f32.mrf.mxu1 }
 0x117   :  { %v143_v19 = vadd.f32 %v142_v18, %v119_v17 }
 0x119   :  { %v150_v20 = vmax.f32 %v143_v19, 0.0 }
 0x11b   :  { %v151_v21 = vadd.f32 1e-06, %v150_v20 }
 0x11d   :  { %v152_v22 = vsel %vm149_vm5, %v151_v21, %v143_v19 }
 0x11e   :  { %153 = vst [vmem:[#allocation10] sm:$0xff] %v152_v22 }
 0x11f   :  { %164 = dma.vmem_to_hbm [thread:$0]  %s160_s9, 128, %s162_s12, [#allocation4]  }
 0x120   :  { %309 = dma.done.wait [#allocation4], 128  }
 0x121   :  { %310 = vsyncadd [#allocation4], 4294967168 }
 0x122   :  { %169 = vsyncpa [#allocation3], 1 }
 0x123   :  { %170 = vsyncpa [#allocation6], 1 }
 0x124   :  { %171 = vsyncpa [#allocation9], 1 }
 0x125   :  { %172 = vsyncpa [#allocation4], 1 }

</bundles_post_ra>
